<compile_context>
chip_gen: v5e
topology: v5e:2x2
jax: 0.10.0
libtpu: 0.0.40
codegen_flags: <defaults>
</compile_context>

<pallas_src>
import jax
import jax.numpy as jnp
from jax.experimental import pallas as pl
from jax.experimental.pallas import tpu as pltpu

HIDDEN_SIZE = 16
INPUT_SIZE = 3
NUM_LAYERS = 1
OUTPUT_SIZE = 3


def _make_rnn_kernel(T, B):
    """Build the fused RNN+Linear kernel for static (T, B)."""

    def rnn_linear_kernel(x_ref, h0_ref, wih_ref, whh_ref, b_ref, wo_ref, bo_ref,
                          y_ref, hn_ref):
        # x_ref  : (T*B, I)  time-major flattened input (row = t*B + b)
        # h0_ref : (B, H)    initial hidden state
        # wih_ref: (I, H)    W_ih^T
        # whh_ref: (H, H)    W_hh^T
        # b_ref  : (1, H)    b_ih + b_hh
        # wo_ref : (H, O)    W_lin^T
        # bo_ref : (1, O)    b_lin
        # y_ref  : (B*T, O)  final output rows in PyTorch order (row = b*T + t)
        # hn_ref : (B, H)    final hidden state
        whh = whh_ref[...]

        # (1) Input projection hoisted out of the recurrence, bias folded in.
        #     f32 MXU default precision is fine at these magnitudes (std=1e-3
        #     weights); switch to precision=HIGHEST if magnitudes ever grow.
        xproj = (jnp.dot(x_ref[...], wih_ref[...],
                         preferred_element_type=jnp.float32)
                 + b_ref[...])                               # (T*B, H)

        # (2) Recurrence: statically unrolled; hidden history kept vreg-resident
        #     (no VMEM round trip, no per-step masked stores).
        # TODO(synk): weight-stationary MXU (matmul_push_rhs/acc_lhs/pop) would
        # remove T redundant W_hh pushes from the serial chain, but is skipped
        # to keep portable, guaranteed lowering across v5e/v6e/v7x for this
        # tiny (16x16) tile.
        h = h0_ref[...]                                      # (B, H)
        hs = []
        for t in range(T):
            x_t = xproj[t * B:(t + 1) * B, :]                # (B, H) static slice
            h = jnp.tanh(x_t + jnp.dot(h, whh,
                                       preferred_element_type=jnp.float32))
            hs.append(h)
        hn_ref[...] = h.astype(hn_ref.dtype)

        # (3) Output Linear: build the (B*T, H) operand directly in PyTorch's
        #     out.view(-1, H) row order (row = b*T + t), one MXU matmul, one
        #     contiguous full-tile store.
        hist = jnp.concatenate(
            [hs[t][b:b + 1, :] for b in range(B) for t in range(T)], axis=0)
        y = (jnp.dot(hist, wo_ref[...], preferred_element_type=jnp.float32)
             + bo_ref[...])                                  # (B*T, O)
        # NOTE: O=3 (<128 lanes) forces a masked store; negligible at this size.
        # If O/H ever grow, keep the output last dim a multiple of 128.
        y_ref[...] = y.astype(y_ref.dtype)

    return rnn_linear_kernel


def rnn_forward(x, hidden_prev, params):
    """x: (B, T, I) float32, hidden_prev: (NUM_LAYERS, B, H) float32."""
    B, T, I = x.shape
    H = params["w_hh"].shape[0]
    O = params["w_out"].shape[0]
    assert hidden_prev.shape[0] == 1  # TODO(synk): kernel implements num_layers == 1 only

    # Tiny (48-float) input reorder to time-major; all other layout work is in-kernel.
    x_tm = jnp.transpose(x, (1, 0, 2)).reshape(T * B, I)     # (T*B, I), row = t*B + b
    h0 = hidden_prev[0]                                      # (B, H)
    wih_t = params["w_ih"].T                                 # (I, H)
    whh_t = params["w_hh"].T                                 # (H, H)
    bias = (params["b_ih"] + params["b_hh"]).reshape(1, H)   # (1, H)
    wo_t = params["w_out"].T                                 # (H, O)
    bo = params["b_out"].reshape(1, O)                       # (1, O)

    # NOTE: everything fits trivially in VMEM here (few KiB).  If T/B ever scale
    # up: introduce a grid with a "parallel" batch axis (2 TensorCores on v7x)
    # and an "arbitrary" time axis with h carried in scratch; size blocks
    # against v7x's 64 MiB physical / 32 MiB default scoped VMEM (half of
    # v5e/v6e), account for 2x double-buffering per input, and set
    # pltpu.CompilerParams(vmem_limit_bytes=...) explicitly.
    y, h_n = pl.pallas_call(
        _make_rnn_kernel(T, B),
        out_shape=(
            jax.ShapeDtypeStruct((B * T, O), jnp.float32),
            jax.ShapeDtypeStruct((B, H), jnp.float32),
        ),
        in_specs=[pl.BlockSpec(memory_space=pltpu.MemorySpace.VMEM)] * 7,
        out_specs=(
            pl.BlockSpec(memory_space=pltpu.MemorySpace.VMEM),
            pl.BlockSpec(memory_space=pltpu.MemorySpace.VMEM),
        ),
    )(x_tm, h0, wih_t, whh_t, bias, wo_t, bo)

    # y already in PyTorch's flattened (b*T + t) order -> no transpose/reshape.
    return y[None], h_n[None]                                # (1, B*T, O), (1, B, H)


def ref_forward(x, hidden_prev, params):
    """Pure-JAX reference of the PyTorch module for validation."""
    B, T, I = x.shape
    h = hidden_prev[0]
    outs = []
    for t in range(T):
        h = jnp.tanh(x[:, t, :] @ params["w_ih"].T + params["b_ih"]
                     + h @ params["w_hh"].T + params["b_hh"])
        outs.append(h)
    rnn_out = jnp.stack(outs, axis=1)                        # (B, T, H)
    flat = rnn_out.reshape(-1, params["w_hh"].shape[0])
    lin = flat @ params["w_out"].T + params["b_out"]
    return lin[None], h[None]


def init_params(key):
    ks = jax.random.split(key, 6)
    H, I, O = HIDDEN_SIZE, INPUT_SIZE, OUTPUT_SIZE
    std = 0.001
    k_lin = 1.0 / jnp.sqrt(H)
    return {
        # nn.RNN params, init.normal_(mean=0, std=0.001)
        "w_ih": std * jax.random.normal(ks[0], (H, I), jnp.float32),
        "w_hh": std * jax.random.normal(ks[1], (H, H), jnp.float32),
        "b_ih": std * jax.random.normal(ks[2], (H,), jnp.float32),
        "b_hh": std * jax.random.normal(ks[3], (H,), jnp.float32),
        # nn.Linear default init (uniform +/- 1/sqrt(fan_in)); created after normal_ loop
        "w_out": jax.random.uniform(ks[4], (O, H), jnp.float32, -k_lin, k_lin),
        "b_out": jax.random.uniform(ks[5], (O,), jnp.float32, -k_lin, k_lin),
    }


if __name__ == "__main__":
    key = jax.random.PRNGKey(0)
    k_p, k_x, k_h = jax.random.split(key, 3)

    B, T = 2, 8
    params = init_params(k_p)
    x = jax.random.normal(k_x, (B, T, INPUT_SIZE), jnp.float32)
    hidden_prev = jax.random.normal(k_h, (NUM_LAYERS, B, HIDDEN_SIZE), jnp.float32)

    out, h_n = jax.jit(rnn_forward)(x, hidden_prev, params)
    out, h_n = jax.block_until_ready((out, h_n))

    out_ref, h_ref = ref_forward(x, hidden_prev, params)
    assert out.shape == (1, B * T, OUTPUT_SIZE), out.shape
    assert h_n.shape == (NUM_LAYERS, B, HIDDEN_SIZE), h_n.shape
    assert jnp.allclose(out, out_ref, atol=1e-5), "output mismatch"
    assert jnp.allclose(h_n, h_ref, atol=1e-5), "hidden mismatch"

    print("KERNEL_OK")
</pallas_src>

<mosaic_0001>
module attributes {stable_mosaic.version = 11 : i64} {
  func.func @rnn_linear_kernel(%arg0: memref<16x3xf32, #tpu.memory_space<vmem>>, %arg1: memref<2x16xf32, #tpu.memory_space<vmem>>, %arg2: memref<3x16xf32, #tpu.memory_space<vmem>>, %arg3: memref<16x16xf32, #tpu.memory_space<vmem>>, %arg4: memref<1x16xf32, #tpu.memory_space<vmem>>, %arg5: memref<16x3xf32, #tpu.memory_space<vmem>>, %arg6: memref<1x3xf32, #tpu.memory_space<vmem>>, %arg7: memref<16x3xf32, #tpu.memory_space<vmem>>, %arg8: memref<2x16xf32, #tpu.memory_space<vmem>>) attributes {dimension_semantics = [], scalar_prefetch = 0 : i64, scratch_operands = 0 : i64, tpu.core_type = #tpu.core_type<tc>} {
    %c0 = arith.constant 0 : index
    %c0_0 = arith.constant 0 : index
    %0 = vector.load %arg3[%c0, %c0_0] : memref<16x16xf32, #tpu.memory_space<vmem>>, vector<16x16xf32>
    %c0_1 = arith.constant 0 : index
    %c0_2 = arith.constant 0 : index
    %1 = vector.load %arg0[%c0_1, %c0_2] : memref<16x3xf32, #tpu.memory_space<vmem>>, vector<16x3xf32>
    %c0_3 = arith.constant 0 : index
    %c0_4 = arith.constant 0 : index
    %2 = vector.load %arg2[%c0_3, %c0_4] : memref<3x16xf32, #tpu.memory_space<vmem>>, vector<3x16xf32>
    %cst = arith.constant dense<0.000000e+00> : vector<16x16xf32>
    %3 = tpu.matmul %1, %2, %cst {dimension_numbers = #tpu.dot_dimension_numbers<[1], [0], [0], [1], [0, 0, 1, 1], [], []>} : vector<16x3xf32>, vector<3x16xf32>, vector<16x16xf32> -> vector<16x16xf32>
    %c0_5 = arith.constant 0 : index
    %c0_6 = arith.constant 0 : index
    %4 = vector.load %arg4[%c0_5, %c0_6] : memref<1x16xf32, #tpu.memory_space<vmem>>, vector<1x16xf32>
    %5 = vector.broadcast %4 : vector<1x16xf32> to vector<16x16xf32>
    %6 = arith.addf %3, %5 : vector<16x16xf32>
    %c0_7 = arith.constant 0 : index
    %c0_8 = arith.constant 0 : index
    %7 = vector.load %arg1[%c0_7, %c0_8] : memref<2x16xf32, #tpu.memory_space<vmem>>, vector<2x16xf32>
    %8 = vector.extract_strided_slice %6 {offsets = [0, 0], sizes = [2, 16], strides = [1, 1]} : vector<16x16xf32> to vector<2x16xf32>
    %cst_9 = arith.constant dense<0.000000e+00> : vector<2x16xf32>
    %9 = tpu.matmul %7, %0, %cst_9 {dimension_numbers = #tpu.dot_dimension_numbers<[1], [0], [0], [1], [0, 0, 1, 1], [], []>} : vector<2x16xf32>, vector<16x16xf32>, vector<2x16xf32> -> vector<2x16xf32>
    %10 = arith.addf %8, %9 : vector<2x16xf32>
    %11 = math.tanh %10 : vector<2x16xf32>
    %12 = vector.extract_strided_slice %6 {offsets = [2, 0], sizes = [2, 16], strides = [1, 1]} : vector<16x16xf32> to vector<2x16xf32>
    %cst_10 = arith.constant dense<0.000000e+00> : vector<2x16xf32>
    %13 = tpu.matmul %11, %0, %cst_10 {dimension_numbers = #tpu.dot_dimension_numbers<[1], [0], [0], [1], [0, 0, 1, 1], [], []>} : vector<2x16xf32>, vector<16x16xf32>, vector<2x16xf32> -> vector<2x16xf32>
    %14 = arith.addf %12, %13 : vector<2x16xf32>
    %15 = math.tanh %14 : vector<2x16xf32>
    %16 = vector.extract_strided_slice %6 {offsets = [4, 0], sizes = [2, 16], strides = [1, 1]} : vector<16x16xf32> to vector<2x16xf32>
    %cst_11 = arith.constant dense<0.000000e+00> : vector<2x16xf32>
    %17 = tpu.matmul %15, %0, %cst_11 {dimension_numbers = #tpu.dot_dimension_numbers<[1], [0], [0], [1], [0, 0, 1, 1], [], []>} : vector<2x16xf32>, vector<16x16xf32>, vector<2x16xf32> -> vector<2x16xf32>
    %18 = arith.addf %16, %17 : vector<2x16xf32>
    %19 = math.tanh %18 : vector<2x16xf32>
    %20 = vector.extract_strided_slice %6 {offsets = [6, 0], sizes = [2, 16], strides = [1, 1]} : vector<16x16xf32> to vector<2x16xf32>
    %cst_12 = arith.constant dense<0.000000e+00> : vector<2x16xf32>
    %21 = tpu.matmul %19, %0, %cst_12 {dimension_numbers = #tpu.dot_dimension_numbers<[1], [0], [0], [1], [0, 0, 1, 1], [], []>} : vector<2x16xf32>, vector<16x16xf32>, vector<2x16xf32> -> vector<2x16xf32>
    %22 = arith.addf %20, %21 : vector<2x16xf32>
    %23 = math.tanh %22 : vector<2x16xf32>
    %24 = vector.extract_strided_slice %6 {offsets = [8, 0], sizes = [2, 16], strides = [1, 1]} : vector<16x16xf32> to vector<2x16xf32>
    %cst_13 = arith.constant dense<0.000000e+00> : vector<2x16xf32>
    %25 = tpu.matmul %23, %0, %cst_13 {dimension_numbers = #tpu.dot_dimension_numbers<[1], [0], [0], [1], [0, 0, 1, 1], [], []>} : vector<2x16xf32>, vector<16x16xf32>, vector<2x16xf32> -> vector<2x16xf32>
    %26 = arith.addf %24, %25 : vector<2x16xf32>
    %27 = math.tanh %26 : vector<2x16xf32>
    %28 = vector.extract_strided_slice %6 {offsets = [10, 0], sizes = [2, 16], strides = [1, 1]} : vector<16x16xf32> to vector<2x16xf32>
    %cst_14 = arith.constant dense<0.000000e+00> : vector<2x16xf32>
    %29 = tpu.matmul %27, %0, %cst_14 {dimension_numbers = #tpu.dot_dimension_numbers<[1], [0], [0], [1], [0, 0, 1, 1], [], []>} : vector<2x16xf32>, vector<16x16xf32>, vector<2x16xf32> -> vector<2x16xf32>
    %30 = arith.addf %28, %29 : vector<2x16xf32>
    %31 = math.tanh %30 : vector<2x16xf32>
    %32 = vector.extract_strided_slice %6 {offsets = [12, 0], sizes = [2, 16], strides = [1, 1]} : vector<16x16xf32> to vector<2x16xf32>
    %cst_15 = arith.constant dense<0.000000e+00> : vector<2x16xf32>
    %33 = tpu.matmul %31, %0, %cst_15 {dimension_numbers = #tpu.dot_dimension_numbers<[1], [0], [0], [1], [0, 0, 1, 1], [], []>} : vector<2x16xf32>, vector<16x16xf32>, vector<2x16xf32> -> vector<2x16xf32>
    %34 = arith.addf %32, %33 : vector<2x16xf32>
    %35 = math.tanh %34 : vector<2x16xf32>
    %36 = vector.extract_strided_slice %6 {offsets = [14, 0], sizes = [2, 16], strides = [1, 1]} : vector<16x16xf32> to vector<2x16xf32>
    %cst_16 = arith.constant dense<0.000000e+00> : vector<2x16xf32>
    %37 = tpu.matmul %35, %0, %cst_16 {dimension_numbers = #tpu.dot_dimension_numbers<[1], [0], [0], [1], [0, 0, 1, 1], [], []>} : vector<2x16xf32>, vector<16x16xf32>, vector<2x16xf32> -> vector<2x16xf32>
    %38 = arith.addf %36, %37 : vector<2x16xf32>
    %39 = math.tanh %38 : vector<2x16xf32>
    %c0_17 = arith.constant 0 : index
    %c0_18 = arith.constant 0 : index
    %40 = vector.load %arg8[%c0_17, %c0_18] : memref<2x16xf32, #tpu.memory_space<vmem>>, vector<2x16xf32>
    tpu.vector_store %arg8[%c0_17, %c0_18], %39 {strides = array<i32>} : memref<2x16xf32, #tpu.memory_space<vmem>>, vector<2x16xf32>,
    %41 = vector.extract_strided_slice %11 {offsets = [0, 0], sizes = [1, 16], strides = [1, 1]} : vector<2x16xf32> to vector<1x16xf32>
    %42 = vector.extract_strided_slice %15 {offsets = [0, 0], sizes = [1, 16], strides = [1, 1]} : vector<2x16xf32> to vector<1x16xf32>
    %43 = vector.extract_strided_slice %19 {offsets = [0, 0], sizes = [1, 16], strides = [1, 1]} : vector<2x16xf32> to vector<1x16xf32>
    %44 = vector.extract_strided_slice %23 {offsets = [0, 0], sizes = [1, 16], strides = [1, 1]} : vector<2x16xf32> to vector<1x16xf32>
    %45 = vector.extract_strided_slice %27 {offsets = [0, 0], sizes = [1, 16], strides = [1, 1]} : vector<2x16xf32> to vector<1x16xf32>
    %46 = vector.extract_strided_slice %31 {offsets = [0, 0], sizes = [1, 16], strides = [1, 1]} : vector<2x16xf32> to vector<1x16xf32>
    %47 = vector.extract_strided_slice %35 {offsets = [0, 0], sizes = [1, 16], strides = [1, 1]} : vector<2x16xf32> to vector<1x16xf32>
    %48 = vector.extract_strided_slice %39 {offsets = [0, 0], sizes = [1, 16], strides = [1, 1]} : vector<2x16xf32> to vector<1x16xf32>
    %49 = vector.extract_strided_slice %11 {offsets = [1, 0], sizes = [1, 16], strides = [1, 1]} : vector<2x16xf32> to vector<1x16xf32>
    %50 = vector.extract_strided_slice %15 {offsets = [1, 0], sizes = [1, 16], strides = [1, 1]} : vector<2x16xf32> to vector<1x16xf32>
    %51 = vector.extract_strided_slice %19 {offsets = [1, 0], sizes = [1, 16], strides = [1, 1]} : vector<2x16xf32> to vector<1x16xf32>
    %52 = vector.extract_strided_slice %23 {offsets = [1, 0], sizes = [1, 16], strides = [1, 1]} : vector<2x16xf32> to vector<1x16xf32>
    %53 = vector.extract_strided_slice %27 {offsets = [1, 0], sizes = [1, 16], strides = [1, 1]} : vector<2x16xf32> to vector<1x16xf32>
    %54 = vector.extract_strided_slice %31 {offsets = [1, 0], sizes = [1, 16], strides = [1, 1]} : vector<2x16xf32> to vector<1x16xf32>
    %55 = vector.extract_strided_slice %35 {offsets = [1, 0], sizes = [1, 16], strides = [1, 1]} : vector<2x16xf32> to vector<1x16xf32>
    %56 = vector.extract_strided_slice %39 {offsets = [1, 0], sizes = [1, 16], strides = [1, 1]} : vector<2x16xf32> to vector<1x16xf32>
    %57 = tpu.concatenate %41, %42, %43, %44, %45, %46, %47, %48, %49, %50, %51, %52, %53, %54, %55, %56 in 0 : vector<1x16xf32>, vector<1x16xf32>, vector<1x16xf32>, vector<1x16xf32>, vector<1x16xf32>, vector<1x16xf32>, vector<1x16xf32>, vector<1x16xf32>, vector<1x16xf32>, vector<1x16xf32>, vector<1x16xf32>, vector<1x16xf32>, vector<1x16xf32>, vector<1x16xf32>, vector<1x16xf32>, vector<1x16xf32> -> vector<16x16xf32>
    %c0_19 = arith.constant 0 : index
    %c0_20 = arith.constant 0 : index
    %58 = vector.load %arg5[%c0_19, %c0_20] : memref<16x3xf32, #tpu.memory_space<vmem>>, vector<16x3xf32>
    %cst_21 = arith.constant dense<0.000000e+00> : vector<16x3xf32>
    %59 = tpu.matmul %57, %58, %cst_21 {dimension_numbers = #tpu.dot_dimension_numbers<[1], [0], [0], [1], [0, 0, 1, 1], [], []>} : vector<16x16xf32>, vector<16x3xf32>, vector<16x3xf32> -> vector<16x3xf32>
    %c0_22 = arith.constant 0 : index
    %c0_23 = arith.constant 0 : index
    %60 = vector.load %arg6[%c0_22, %c0_23] : memref<1x3xf32, #tpu.memory_space<vmem>>, vector<1x3xf32>
    %61 = vector.broadcast %60 : vector<1x3xf32> to vector<16x3xf32>
    %62 = arith.addf %59, %61 : vector<16x3xf32>
    %c0_24 = arith.constant 0 : index
    %c0_25 = arith.constant 0 : index
    %63 = vector.load %arg7[%c0_24, %c0_25] : memref<16x3xf32, #tpu.memory_space<vmem>>, vector<16x3xf32>
    tpu.vector_store %arg7[%c0_24, %c0_25], %62 {strides = array<i32>} : memref<16x3xf32, #tpu.memory_space<vmem>>, vector<16x3xf32>,
    return
  }
}

</mosaic_0001>

<bundles_post_ra>
// kernel: rnn_forward.1
= control target key start
LH: loop header
LB: loop body
LE: loop exit
PB: predicated region body
PF: predicated region fallthrough
CT: control target
= control target key end

     0   :  { %vm45_vm0 = vcmask 1042432   ;;  %vm38_vm1 = vcmask 23552   ;;  %vm73_vm2 = vcmask 130048   ;;  %s564_s0 = inlined_call_operand.vmem [shape: f32[16,3], index: 0, kind: input, shape index: {}]   ;;  %s565_s1 = inlined_call_operand.vmem [shape: f32[2,16], index: 1, kind: input, shape index: {}]   ;;  %s566_s2 = inlined_call_operand.vmem [shape: f32[3,16], index: 2, kind: input, shape index: {}]   ;;  %s567_s3 = inlined_call_operand.vmem [shape: f32[16,16], index: 3, kind: input, shape index: {}]   ;;  %s568_s4 = inlined_call_operand.vmem [shape: f32[1,16], index: 4, kind: input, shape index: {}]   ;;  %s569_s5 = inlined_call_operand.vmem [shape: f32[16,3], index: 5, kind: input, shape index: {}]   ;;  %s570_s6 = inlined_call_operand.vmem [shape: f32[1,3], index: 6, kind: input, shape index: {}]   ;;  %s571_s7 = inlined_call_operand.vmem [shape: f32[16,3], index: 7, kind: output, shape index: {0}]   ;;  %s572_s8 = inlined_call_operand.hbm [shape: f32[2,16], index: 8, kind: output, shape index: {1}]  }
   0x1   :  { %v33_v0 = vld [vmem:[%s566_s2] sm:$0x7]  ;;  %v30_v1 = vld [vmem:[%s567_s3 + $0x8] sm:$0xff] }
   0x2   :  { %v31_v2 = vld [vmem:[%s564_s0] sm:$0xff]  ;;  %404 = vmatpush.msk.msra.mxu0 %vm45_vm0, %v33_v0  ;;  %91 = vmatpush.msra.mxu1 %v30_v1 }
   0x3   :  { %v29_v3 = vld [vmem:[%s567_s3] sm:$0xff]  ;;  %405 = vmatmul.msk.f32.vlgmr.msra.gmra.mxu0 %vm38_vm1, %v31_v2  ;;  %116 = vmatpush.msra.mxu3 %v30_v1 }
   0x4   :  { %v72_v4 = vld [vmem:[%s565_s1] sm:$0x3] }
   0x5   :  { %14 = vsyncpa [#allocation3], 0  ;;  %92 = vmatpush.msra.mxu1 %v29_v3  ;;  %203 = vmatpush.msra.mxu2 %v30_v1  ;;  %v418_v5 = vld [vmem:[%s568_s4] ss:$0 sm:$0xff]  ;;  %vm327_vm3 = vcmask 1040384   ;;  %vm329_vm4 = vcmask 1041408  }
   0x6   :  { %407 = vmatmul.msk.f32.vlgmr.msra.gmra.mxu1 %vm73_vm2, %v72_v4  ;;  %117 = vmatpush.msra.mxu3 %v29_v3  ;;  %v32_v29 = vld [vmem:[%s564_s0 + $0x8] sm:$0xff]  ;;  %vm332_vm5 = vcmask 1043456   ;;  %vm334_vm6 = vcmask 1044480   ;;  %vm336_vm7 = vcmask 1045504   ;;  %vm297_vm8 = vcmask 130054   ;;  %s462_s18 = smov [#allocation2]  }
   0x7   :  { %174 = vmatpush.msrb.mxu1 %v30_v1  ;;  %204 = vmatpush.msra.mxu2 %v29_v3  ;;  %v348_v2 = vld [vmem:[%s569_s5 + $0x8] sm:$0xff]  ;;  %vm338_vm9 = vcmask 1046528   ;;  %s391_s19 = sshll.u32 %s462_s18, 4  ;;  %s393_s21 = sshll.u32 %s572_s8, 4  ;;  %s392_s19 = int_to_ptr.vmem [resolvable:$true] %s391_s19  ;;  %s394_s21 = int_to_ptr.hbm [resolvable:$true] %s393_s21 }
   0x8   :  { %145 = vmatpush.msrb.mxu3 %v30_v1  ;;  %257 = vmatpush.msrb.mxu0 %v30_v1 }
   0x9   :  { %175 = vmatpush.msrb.mxu1 %v29_v3  ;;  %373 = vmatpush.msrb.mxu2 %v348_v2 }
   0xa   :  { %146 = vmatpush.msrb.mxu3 %v29_v3  ;;  %258 = vmatpush.msrb.mxu0 %v29_v3 }
   0xb   :  { %286 = vmatpush.msra.mxu1 %v30_v1  ;;  %406 = vmatmul.msk.f32.gmra.mxu0 %vm38_vm1, %v32_v29 }
   0xd   :  { %287 = vmatpush.msra.mxu1 %v29_v3 }
  0x80   :  { %v66_v6 = vpop.f32.mrf.mxu0 }
  0x81   :  { %v67_v7 = vadd.f32 %v418_v5, %v66_v6 }
  0x83   :  { %v94_v8 = vpop.f32.mrf.mxu1 }
  0x84   :  { %v97_v9 = vadd.f32 %v94_v8, %v67_v7 }
  0x86   :  { %420 = vtanh.f32 %v97_v9 }
  0x88   :  { %v69_v39 = vpop.f32.mrf.mxu0 }
  0x89   :  { %v70_v40 = vadd.f32 %v418_v5, %v69_v39 }
  0x8c   :  { %v421_v10 = vpop.eup %420 }
  0x8d   :  { %408 = vmatmul.msk.f32.vlgmr.msra.gmra.mxu3 %vm73_vm2, %v421_v10  ;;  %v314_v21 = vrot.slane %v421_v10, 1 }
  0x8e   :  { %228 = vmatpush.msra.mxu3 %v30_v1 }
  0x90   :  { %229 = vmatpush.msra.mxu3 %v29_v3  ;;  %v347_v3 = vld [vmem:[%s569_s5] sm:$0xff] }
  0x91   :  { %374 = vmatpush.msrb.mxu2 %v347_v3 }
 0x110   :  { %v119_v11 = vpop.f32.mrf.mxu3 }
 0x111   :  { %v123_v12 = vrot.slane %v119_v11, 6  ;;  %v419_v11 = vld [vmem:[%s570_s6] ss:$0 sm:$0xff] }
 0x113   :  { %v125_v13 = vadd.f32 %v123_v12, %v67_v7 }
 0x115   :  { %422 = vtanh.f32 %v125_v13 }
 0x11b   :  { %v423_v14 = vpop.eup %422 }
 0x11c   :  { %v128_v15 = vrot.slane %v423_v14, 2  ;;  %v299_v19 = vrot.slane %v423_v14, 1 }
 0x11e   :  { %409 = vmatmul.msk.f32.vlgmr.msrb.gmra.mxu3 %vm73_vm2, %v128_v15  ;;  %v328_v25 = vsel %vm327_vm3, %v421_v10, %v299_v19  ;;  %v340_v26 = vsel %vm327_vm3, %v314_v21, %v128_v15 }
 0x1a1   :  { %v148_v16 = vpop.f32.mrf.mxu3 }
 0x1a2   :  { %v152_v17 = vrot.slane %v148_v16, 4 }
 0x1a4   :  { %v154_v18 = vadd.f32 %v152_v17, %v67_v7 }
 0x1a6   :  { %424 = vtanh.f32 %v154_v18 }
 0x1ac   :  { %v425_v20 = vpop.eup %424 }
 0x1ad   :  { %v301_v22 = vrot.slane %v425_v20, 2  ;;  %v157_v23 = vrot.slane %v425_v20, 4  ;;  %v317_v24 = vrot.slane %v425_v20, 3 }
 0x1af   :  { %410 = vmatmul.msk.f32.vlgmr.msrb.gmra.mxu1 %vm73_vm2, %v157_v23  ;;  %v330_v27 = vsel %vm329_vm4, %v328_v25, %v301_v22  ;;  %v341_v28 = vsel %vm329_vm4, %v340_v26, %v317_v24 }
 0x22c   :  { %v177_v30 = vpop.f32.mrf.mxu1 }
 0x22d   :  { %v181_v31 = vrot.slane %v177_v30, 2 }
 0x22f   :  { %v183_v32 = vadd.f32 %v181_v31, %v67_v7 }
 0x231   :  { %426 = vtanh.f32 %v183_v32 }
 0x237   :  { %v427_v33 = vpop.eup %426 }
 0x238   :  { %v186_v34 = vrot.slane %v427_v33, 6  ;;  %v303_v35 = vrot.slane %v427_v33, 3  ;;  %v319_v36 = vrot.slane %v427_v33, 4 }
 0x23a   :  { %411 = vmatmul.msk.f32.vlgmr.msra.gmra.mxu2 %vm73_vm2, %v186_v34  ;;  %v331_v37 = vsel %vm45_vm0, %v330_v27, %v303_v35  ;;  %v342_v38 = vsel %vm45_vm0, %v341_v28, %v319_v36 }
 0x2bd   :  { %v206_v41 = vpop.f32.mrf.mxu2 }
 0x2be   :  { %v209_v42 = vadd.f32 %v206_v41, %v70_v40 }
 0x2c0   :  { %428 = vtanh.f32 %v209_v42 }
 0x2c6   :  { %v429_v43 = vpop.eup %428 }
 0x2c7   :  { %412 = vmatmul.msk.f32.vlgmr.msra.gmra.mxu3 %vm73_vm2, %v429_v43  ;;  %v305_v44 = vrot.slane %v429_v43, 4  ;;  %v321_v45 = vrot.slane %v429_v43, 5 }
 0x2c9   :  { %v333_v46 = vsel %vm332_vm5, %v331_v37, %v305_v44  ;;  %v343_v47 = vsel %vm332_vm5, %v342_v38, %v321_v45 }
 0x34a   :  { %v231_v48 = vpop.f32.mrf.mxu3 }
 0x34b   :  { %v235_v49 = vrot.slane %v231_v48, 6 }
 0x34d   :  { %v237_v50 = vadd.f32 %v235_v49, %v70_v40 }
 0x34f   :  { %430 = vtanh.f32 %v237_v50 }
 0x355   :  { %v431_v51 = vpop.eup %430 }
 0x356   :  { %v240_v52 = vrot.slane %v431_v51, 2  ;;  %v307_v53 = vrot.slane %v431_v51, 5  ;;  %v323_v54 = vrot.slane %v431_v51, 6 }
 0x358   :  { %413 = vmatmul.msk.f32.vlgmr.msrb.gmra.mxu0 %vm73_vm2, %v240_v52  ;;  %v335_v55 = vsel %vm334_vm6, %v333_v46, %v307_v53  ;;  %v344_v56 = vsel %vm334_vm6, %v343_v47, %v323_v54 }
 0x3d5   :  { %v260_v57 = vpop.f32.mrf.mxu0 }
 0x3d6   :  { %v264_v58 = vrot.slane %v260_v57, 4 }
 0x3d8   :  { %v266_v59 = vadd.f32 %v264_v58, %v70_v40 }
 0x3da   :  { %432 = vtanh.f32 %v266_v59 }
 0x3e0   :  { %v433_v60 = vpop.eup %432 }
 0x3e1   :  { %v269_v61 = vrot.slane %v433_v60, 4  ;;  %v309_v62 = vrot.slane %v433_v60, 6  ;;  %v325_v63 = vrot.slane %v433_v60, 7 }
 0x3e3   :  { %414 = vmatmul.msk.f32.vlgmr.msra.gmra.mxu1 %vm73_vm2, %v269_v61  ;;  %v337_v0 = vsel %vm336_vm7, %v335_v55, %v309_v62  ;;  %v345_v1 = vsel %vm336_vm7, %v344_v56, %v325_v63 }
 0x460   :  { %v289_v4 = vpop.f32.mrf.mxu1 }
 0x461   :  { %v293_v5 = vrot.slane %v289_v4, 2 }
 0x463   :  { %v295_v6 = vadd.f32 %v293_v5, %v70_v40 }
 0x465   :  { %434 = vtanh.f32 %v295_v6 }
 0x46b   :  { %v435_v7 = vpop.eup %434 }
 0x46c   :  { %v312_v8 = vrot.slane %v435_v7, 7  ;;  %298 = vst.msk [vmem:[#allocation2 - $0x6] sm:$0xc0] %vm297_vm8, %v435_v7  ;;  %v346_v10 = vsel %vm338_vm9, %v345_v1, %v435_v7 }
 0x46d   :  { %396 = dma.vmem_to_hbm [thread:$0]  %s392_s19, 32, %s394_s21, [#allocation3]  }
 0x46e   :  { %v339_v9 = vsel %vm338_vm9, %v337_v0, %v312_v8 }
 0x46f   :  { %415 = vmatmul.msk.f32.vlgmr.msrb.gmra.mxu2 %vm73_vm2, %v339_v9 }
 0x477   :  { %416 = vmatmul.msk.f32.gmra.mxu2 %vm73_vm2, %v346_v10 }
 0x4f2   :  { %v376_v12 = vpop.f32.mrf.mxu2 }
 0x4f3   :  { %v377_v13 = vadd.f32 %v419_v11, %v376_v12 }
 0x4f5   :  { %382 = vst.msk [vmem:[%s571_s7] sm:$0xff] %vm38_vm1, %v377_v13 }
 0x4fa   :  { %v379_v14 = vpop.f32.mrf.mxu2 }
 0x4fb   :  { %v380_v15 = vadd.f32 %v419_v11, %v379_v14 }
 0x4fd   :  { %383 = vst.msk [vmem:[%s571_s7 + $0x8] sm:$0xff] %vm38_vm1, %v380_v15 }
 0x4fe   :  { %460 = dma.done.wait [#allocation3], 32  }
 0x4ff   :  { %461 = vsyncadd [#allocation3], 4294967264 }
 0x500   :  { %403 = vsyncpa [#allocation3], 1 }

</bundles_post_ra>
